<compile_context>
chip_gen: v5e
topology: v5e:2x2
jax: 0.10.0
libtpu: 0.0.40
codegen_flags: <defaults>
</compile_context>

<pallas_src>
import functools

import jax
import jax.numpy as jnp
from jax.experimental import pallas as pl
from jax.experimental.pallas import tpu as pltpu


def _controller_kernel(output_scale,
                       state_ref, obstacle_ref, u_nom_ref, err_ref,
                       w0_ref, b0_ref, w1_ref, b1_ref, w2_ref, b2_ref,
                       wf0x_ref, wf0u_ref, wf0e_ref, bf0_ref,
                       wf1_ref, bf1_ref, wf2_ref, bf2_ref,
                       out_ref):
    s = state_ref[...]          # (B, n_state)
    obs = obstacle_ref[...]     # (B, k, n_state)
    u = u_nom_ref[...]          # (B, m_control)
    e = err_ref[...]            # (B, n_state)

    B, k, n = obs.shape         # static block shape

    # state_diff: rows = (batch, obstacle) points, cols = state dims.
    sd = jnp.broadcast_to(s[:, None, :], (B, k, n)) - obs        # (B, k, n)
    sd2 = sd.reshape(B * k, n)                                   # (B*k, n)

    # conv0 / conv1 / conv2 (kernel size 1) == matmuls with M = B*k, + ReLU.
    h = jnp.maximum(
        jnp.dot(sd2, w0_ref[...], preferred_element_type=jnp.float32)
        + b0_ref[...], 0.0)
    h = jnp.maximum(
        jnp.dot(h, w1_ref[...], preferred_element_type=jnp.float32)
        + b1_ref[...], 0.0)
    h = jnp.maximum(
        jnp.dot(h, w2_ref[...], preferred_element_type=jnp.float32)
        + b2_ref[...], 0.0)                                      # (B*k, 128)

    # torch.max over the obstacle dimension (segmented max, XLU reduce).
    x = jnp.max(h.reshape(B, k, h.shape[-1]), axis=1)            # (B, 128)

    # fc0 on concat([x, u_nominal, state_error]) == sum of 3 partial matmuls.
    y = (jnp.dot(x, wf0x_ref[...], preferred_element_type=jnp.float32)
         + jnp.dot(u, wf0u_ref[...], preferred_element_type=jnp.float32)
         + jnp.dot(e, wf0e_ref[...], preferred_element_type=jnp.float32)
         + bf0_ref[...])
    y = jnp.maximum(y, 0.0)                                      # (B, 128)
    y = jnp.maximum(
        jnp.dot(y, wf1_ref[...], preferred_element_type=jnp.float32)
        + bf1_ref[...], 0.0)                                     # (B, 64)
    y = jnp.tanh(
        jnp.dot(y, wf2_ref[...], preferred_element_type=jnp.float32)
        + bf2_ref[...]) * output_scale                           # (B, m_control)

    out_ref[...] = (y + u).astype(out_ref.dtype)


def nn_controller_forward(params, state, obstacle, u_nominal, state_error,
                          output_scale=1.0, b_tile=512):
    """Pallas implementation of NNController.forward (preprocess_func=None).

    state:        (bs, n_state)
    obstacle:     (bs, k_obstacle, n_state)
    u_nominal:    (bs, m_control)
    state_error:  (bs, n_state)
    returns u:    (bs, m_control)
    """
    # TODO(synk): preprocess_func is an arbitrary user callable (None by
    # default) and is not translated; only the None path is implemented.
    bs, n_state = state.shape
    _, k_obstacle, _ = obstacle.shape
    m_control = u_nominal.shape[1]

    # Pad k_obstacle to a multiple of 8 by repeating the last obstacle point
    # (duplicate rows do not change the max over obstacles).
    k_pad = (-k_obstacle) % 8
    if k_pad:
        obstacle = jnp.concatenate(
            [obstacle,
             jnp.broadcast_to(obstacle[:, -1:, :], (bs, k_pad, n_state))],
            axis=1)
    k_p = k_obstacle + k_pad

    # Batch tile: a multiple of 8, capped at b_tile (VMEM-safe on v5e/v6e/v7x
    # at the default 512: h activations are ~2 MiB per stage).
    b_tile = max(8, (int(b_tile) // 8) * 8)
    b_eff = min(b_tile, max(8, -(-bs // 8) * 8))
    bs_p = -(-bs // b_eff) * b_eff
    pad_b = bs_p - bs
    if pad_b:
        state = jnp.pad(state, ((0, pad_b), (0, 0)))
        obstacle = jnp.pad(obstacle, ((0, pad_b), (0, 0), (0, 0)))
        u_nominal = jnp.pad(u_nominal, ((0, pad_b), (0, 0)))
        state_error = jnp.pad(state_error, ((0, pad_b), (0, 0)))

    # Split fc0 weight into the three concat segments [x, u_nominal, state_error].
    wf0 = params["wf0"]
    wf0x = wf0[:128]
    wf0u = wf0[128:128 + m_control]
    wf0e = wf0[128 + m_control:]

    weights = [
        params["w0"], params["b0"],
        params["w1"], params["b1"],
        params["w2"], params["b2"],
        wf0x, wf0u, wf0e, params["bf0"],
        params["wf1"], params["bf1"],
        params["wf2"], params["bf2"],
    ]

    grid = (bs_p // b_eff,)

    in_specs = [
        pl.BlockSpec((b_eff, n_state), lambda i: (i, 0)),           # state
        pl.BlockSpec((b_eff, k_p, n_state), lambda i: (i, 0, 0)),   # obstacle
        pl.BlockSpec((b_eff, m_control), lambda i: (i, 0)),         # u_nominal
        pl.BlockSpec((b_eff, n_state), lambda i: (i, 0)),           # state_error
    ] + [pl.BlockSpec(w.shape, lambda i: (0, 0)) for w in weights]  # weights (resident)

    out = pl.pallas_call(
        functools.partial(_controller_kernel, float(output_scale)),
        out_shape=jax.ShapeDtypeStruct((bs_p, m_control), jnp.float32),
        grid=grid,
        in_specs=in_specs,
        out_specs=pl.BlockSpec((b_eff, m_control), lambda i: (i, 0)),
        compiler_params=pltpu.CompilerParams(
            dimension_semantics=("parallel",)),
    )(state, obstacle, u_nominal, state_error, *weights)

    return out[:bs]


def init_params(key, n_state, m_control):
    """Deterministic init mimicking PyTorch default uniform(-1/sqrt(fan_in), ...).

    Weights are stored pre-transposed so that y = x @ W + b.
    """
    def layer(k, fan_in, fan_out):
        k1, k2 = jax.random.split(k)
        bound = 1.0 / float(fan_in) ** 0.5
        w = jax.random.uniform(k1, (fan_in, fan_out), jnp.float32, -bound, bound)
        b = jax.random.uniform(k2, (1, fan_out), jnp.float32, -bound, bound)
        return w, b

    keys = jax.random.split(key, 6)
    w0, b0 = layer(keys[0], n_state, 64)                        # conv0 (kernel 1)
    w1, b1 = layer(keys[1], 64, 128)                            # conv1
    w2, b2 = layer(keys[2], 128, 128)                           # conv2
    wf0, bf0 = layer(keys[3], 128 + m_control + n_state, 128)   # fc0
    wf1, bf1 = layer(keys[4], 128, 64)                          # fc1
    wf2, bf2 = layer(keys[5], 64, m_control)                    # fc2
    return dict(w0=w0, b0=b0, w1=w1, b1=b1, w2=w2, b2=b2,
                wf0=wf0, bf0=bf0, wf1=wf1, bf1=bf1, wf2=wf2, bf2=bf2)


def reference_forward(params, state, obstacle, u_nominal, state_error,
                      output_scale=1.0):
    """Pure-JAX reference (same math as the PyTorch module, preprocess_func=None)."""
    sd = state[:, None, :] - obstacle                           # (bs, k, n)
    h = jax.nn.relu(sd @ params["w0"] + params["b0"])
    h = jax.nn.relu(h @ params["w1"] + params["b1"])
    h = jax.nn.relu(h @ params["w2"] + params["b2"])
    x = jnp.max(h, axis=1)                                      # (bs, 128)
    feat = jnp.concatenate([x, u_nominal, state_error], axis=1)
    y = jax.nn.relu(feat @ params["wf0"] + params["bf0"])
    y = jax.nn.relu(y @ params["wf1"] + params["bf1"])
    y = jnp.tanh(y @ params["wf2"] + params["bf2"]) * output_scale
    return y + u_nominal


if __name__ == "__main__":
    n_state, k_obstacle, m_control = 4, 8, 2
    output_scale = 1.0

    key = jax.random.PRNGKey(0)
    kp, kd = jax.random.split(key)
    params = init_params(kp, n_state, m_control)

    def make_inputs(k, bs):
        ks, ko, ku, ke = jax.random.split(k, 4)
        return (jax.random.normal(ks, (bs, n_state), jnp.float32),
                jax.random.normal(ko, (bs, k_obstacle, n_state), jnp.float32),
                jax.random.normal(ku, (bs, m_control), jnp.float32),
                jax.random.normal(ke, (bs, n_state), jnp.float32))

    # Case 1: spec-sized small batch (single tile).
    k1, k2 = jax.random.split(kd)
    state, obstacle, u_nominal, state_error = make_inputs(k1, 2)
    u = nn_controller_forward(params, state, obstacle, u_nominal, state_error,
                              output_scale)
    u = jax.block_until_ready(u)
    u_ref = reference_forward(params, state, obstacle, u_nominal, state_error,
                              output_scale)
    assert u.shape == (2, m_control)
    assert jnp.allclose(u, u_ref, atol=2e-3, rtol=2e-3), (u, u_ref)

    # Case 2: exercises multi-tile grid + batch padding (bs=50, tile=16).
    state, obstacle, u_nominal, state_error = make_inputs(k2, 50)
    u = nn_controller_forward(params, state, obstacle, u_nominal, state_error,
                              output_scale, b_tile=16)
    u = jax.block_until_ready(u)
    u_ref = reference_forward(params, state, obstacle, u_nominal, state_error,
                              output_scale)
    assert u.shape == (50, m_control)
    assert jnp.allclose(u, u_ref, atol=2e-3, rtol=2e-3), (u, u_ref)

    print("KERNEL_OK")
</pallas_src>

<mosaic_0001>
module attributes {stable_mosaic.version = 11 : i64} {
  func.func @_controller_kernel(%arg0: i32, %arg1: memref<8x4xf32, #tpu.memory_space<vmem>>, %arg2: memref<8x8x4xf32, #tpu.memory_space<vmem>>, %arg3: memref<8x2xf32, #tpu.memory_space<vmem>>, %arg4: memref<8x4xf32, #tpu.memory_space<vmem>>, %arg5: memref<4x64xf32, #tpu.memory_space<vmem>>, %arg6: memref<1x64xf32, #tpu.memory_space<vmem>>, %arg7: memref<64x128xf32, #tpu.memory_space<vmem>>, %arg8: memref<1x128xf32, #tpu.memory_space<vmem>>, %arg9: memref<128x128xf32, #tpu.memory_space<vmem>>, %arg10: memref<1x128xf32, #tpu.memory_space<vmem>>, %arg11: memref<128x128xf32, #tpu.memory_space<vmem>>, %arg12: memref<2x128xf32, #tpu.memory_space<vmem>>, %arg13: memref<4x128xf32, #tpu.memory_space<vmem>>, %arg14: memref<1x128xf32, #tpu.memory_space<vmem>>, %arg15: memref<128x64xf32, #tpu.memory_space<vmem>>, %arg16: memref<1x64xf32, #tpu.memory_space<vmem>>, %arg17: memref<64x2xf32, #tpu.memory_space<vmem>>, %arg18: memref<1x2xf32, #tpu.memory_space<vmem>>, %arg19: memref<8x2xf32, #tpu.memory_space<vmem>>) attributes {dimension_semantics = [#tpu.dimension_semantics<parallel>], iteration_bounds = array<i64: 1>, scalar_prefetch = 0 : i64, scratch_operands = 0 : i64, tpu.core_type = #tpu.core_type<tc>, window_params = [{transform_indices = @transform_0, window_bounds = array<i64: 8, 4>}, {transform_indices = @transform_1, window_bounds = array<i64: 8, 8, 4>}, {transform_indices = @transform_2, window_bounds = array<i64: 8, 2>}, {transform_indices = @transform_3, window_bounds = array<i64: 8, 4>}, {pipeline_mode = #tpu.pipeline_mode<synchronous>, transform_indices = @transform_4, window_bounds = array<i64: 4, 64>}, {pipeline_mode = #tpu.pipeline_mode<synchronous>, transform_indices = @transform_5, window_bounds = array<i64: 1, 64>}, {pipeline_mode = #tpu.pipeline_mode<synchronous>, transform_indices = @transform_6, window_bounds = array<i64: 64, 128>}, {pipeline_mode = #tpu.pipeline_mode<synchronous>, transform_indices = @transform_7, window_bounds = array<i64: 1, 128>}, {pipeline_mode = #tpu.pipeline_mode<synchronous>, transform_indices = @transform_8, window_bounds = array<i64: 128, 128>}, {pipeline_mode = #tpu.pipeline_mode<synchronous>, transform_indices = @transform_9, window_bounds = array<i64: 1, 128>}, {pipeline_mode = #tpu.pipeline_mode<synchronous>, transform_indices = @transform_10, window_bounds = array<i64: 128, 128>}, {pipeline_mode = #tpu.pipeline_mode<synchronous>, transform_indices = @transform_11, window_bounds = array<i64: 2, 128>}, {pipeline_mode = #tpu.pipeline_mode<synchronous>, transform_indices = @transform_12, window_bounds = array<i64: 4, 128>}, {pipeline_mode = #tpu.pipeline_mode<synchronous>, transform_indices = @transform_13, window_bounds = array<i64: 1, 128>}, {pipeline_mode = #tpu.pipeline_mode<synchronous>, transform_indices = @transform_14, window_bounds = array<i64: 128, 64>}, {pipeline_mode = #tpu.pipeline_mode<synchronous>, transform_indices = @transform_15, window_bounds = array<i64: 1, 64>}, {pipeline_mode = #tpu.pipeline_mode<synchronous>, transform_indices = @transform_16, window_bounds = array<i64: 64, 2>}, {pipeline_mode = #tpu.pipeline_mode<synchronous>, transform_indices = @transform_17, window_bounds = array<i64: 1, 2>}, {transform_indices = @transform_18, window_bounds = array<i64: 8, 2>}]} {
    %c0 = arith.constant 0 : index
    %c0_0 = arith.constant 0 : index
    %0 = vector.load %arg1[%c0, %c0_0] : memref<8x4xf32, #tpu.memory_space<vmem>>, vector<8x4xf32>
    %c0_1 = arith.constant 0 : index
    %c0_2 = arith.constant 0 : index
    %c0_3 = arith.constant 0 : index
    %1 = vector.load %arg2[%c0_1, %c0_2, %c0_3] : memref<8x8x4xf32, #tpu.memory_space<vmem>>, vector<8x8x4xf32>
    %c0_4 = arith.constant 0 : index
    %c0_5 = arith.constant 0 : index
    %2 = vector.load %arg3[%c0_4, %c0_5] : memref<8x2xf32, #tpu.memory_space<vmem>>, vector<8x2xf32>
    %c0_6 = arith.constant 0 : index
    %c0_7 = arith.constant 0 : index
    %3 = vector.load %arg4[%c0_6, %c0_7] : memref<8x4xf32, #tpu.memory_space<vmem>>, vector<8x4xf32>
    %4 = vector.shape_cast %0 : vector<8x4xf32> to vector<8x1x4xf32>
    %5 = vector.shape_cast %4 : vector<8x1x4xf32> to vector<8x1x4xf32>
    %6 = vector.broadcast %5 : vector<8x1x4xf32> to vector<8x8x4xf32>
    %7 = arith.subf %6, %1 : vector<8x8x4xf32>
    %8 = vector.shape_cast %7 : vector<8x8x4xf32> to vector<64x4xf32>
    %c0_8 = arith.constant 0 : index
    %c0_9 = arith.constant 0 : index
    %9 = vector.load %arg5[%c0_8, %c0_9] : memref<4x64xf32, #tpu.memory_space<vmem>>, vector<4x64xf32>
    %cst = arith.constant dense<0.000000e+00> : vector<64x64xf32>
    %10 = tpu.matmul %8, %9, %cst {dimension_numbers = #tpu.dot_dimension_numbers<[1], [0], [0], [1], [0, 0, 1, 1], [], []>} : vector<64x4xf32>, vector<4x64xf32>, vector<64x64xf32> -> vector<64x64xf32>
    %c0_10 = arith.constant 0 : index
    %c0_11 = arith.constant 0 : index
    %11 = vector.load %arg6[%c0_10, %c0_11] : memref<1x64xf32, #tpu.memory_space<vmem>>, vector<1x64xf32>
    %12 = vector.broadcast %11 : vector<1x64xf32> to vector<64x64xf32>
    %13 = arith.addf %10, %12 : vector<64x64xf32>
    %cst_12 = arith.constant 0.000000e+00 : f32
    %14 = vector.broadcast %cst_12 : f32 to vector<64x64xf32>
    %15 = arith.maximumf %13, %14 : vector<64x64xf32>
    %c0_13 = arith.constant 0 : index
    %c0_14 = arith.constant 0 : index
    %16 = vector.load %arg7[%c0_13, %c0_14] : memref<64x128xf32, #tpu.memory_space<vmem>>, vector<64x128xf32>
    %cst_15 = arith.constant dense<0.000000e+00> : vector<64x128xf32>
    %17 = tpu.matmul %15, %16, %cst_15 {dimension_numbers = #tpu.dot_dimension_numbers<[1], [0], [0], [1], [0, 0, 1, 1], [], []>} : vector<64x64xf32>, vector<64x128xf32>, vector<64x128xf32> -> vector<64x128xf32>
    %c0_16 = arith.constant 0 : index
    %c0_17 = arith.constant 0 : index
    %18 = vector.load %arg8[%c0_16, %c0_17] : memref<1x128xf32, #tpu.memory_space<vmem>>, vector<1x128xf32>
    %19 = vector.broadcast %18 : vector<1x128xf32> to vector<64x128xf32>
    %20 = arith.addf %17, %19 : vector<64x128xf32>
    %cst_18 = arith.constant 0.000000e+00 : f32
    %21 = vector.broadcast %cst_18 : f32 to vector<64x128xf32>
    %22 = arith.maximumf %20, %21 : vector<64x128xf32>
    %c0_19 = arith.constant 0 : index
    %c0_20 = arith.constant 0 : index
    %23 = vector.load %arg9[%c0_19, %c0_20] : memref<128x128xf32, #tpu.memory_space<vmem>>, vector<128x128xf32>
    %cst_21 = arith.constant dense<0.000000e+00> : vector<64x128xf32>
    %24 = tpu.matmul %22, %23, %cst_21 {dimension_numbers = #tpu.dot_dimension_numbers<[1], [0], [0], [1], [0, 0, 1, 1], [], []>} : vector<64x128xf32>, vector<128x128xf32>, vector<64x128xf32> -> vector<64x128xf32>
    %c0_22 = arith.constant 0 : index
    %c0_23 = arith.constant 0 : index
    %25 = vector.load %arg10[%c0_22, %c0_23] : memref<1x128xf32, #tpu.memory_space<vmem>>, vector<1x128xf32>
    %26 = vector.broadcast %25 : vector<1x128xf32> to vector<64x128xf32>
    %27 = arith.addf %24, %26 : vector<64x128xf32>
    %cst_24 = arith.constant 0.000000e+00 : f32
    %28 = vector.broadcast %cst_24 : f32 to vector<64x128xf32>
    %29 = arith.maximumf %27, %28 : vector<64x128xf32>
    %30 = vector.shape_cast %29 : vector<64x128xf32> to vector<8x8x128xf32>
    %cst_25 = arith.constant dense<0xFF800000> : vector<8x128xf32>
    %31 = vector.multi_reduction <maximumf>, %30, %cst_25 [1] : vector<8x8x128xf32> to vector<8x128xf32>
    %c0_26 = arith.constant 0 : index
    %c0_27 = arith.constant 0 : index
    %32 = vector.load %arg11[%c0_26, %c0_27] : memref<128x128xf32, #tpu.memory_space<vmem>>, vector<128x128xf32>
    %cst_28 = arith.constant dense<0.000000e+00> : vector<8x128xf32>
    %33 = tpu.matmul %31, %32, %cst_28 {dimension_numbers = #tpu.dot_dimension_numbers<[1], [0], [0], [1], [0, 0, 1, 1], [], []>} : vector<8x128xf32>, vector<128x128xf32>, vector<8x128xf32> -> vector<8x128xf32>
    %c0_29 = arith.constant 0 : index
    %c0_30 = arith.constant 0 : index
    %34 = vector.load %arg12[%c0_29, %c0_30] : memref<2x128xf32, #tpu.memory_space<vmem>>, vector<2x128xf32>
    %cst_31 = arith.constant dense<0.000000e+00> : vector<8x128xf32>
    %35 = tpu.matmul %2, %34, %cst_31 {dimension_numbers = #tpu.dot_dimension_numbers<[1], [0], [0], [1], [0, 0, 1, 1], [], []>} : vector<8x2xf32>, vector<2x128xf32>, vector<8x128xf32> -> vector<8x128xf32>
    %36 = arith.addf %33, %35 : vector<8x128xf32>
    %c0_32 = arith.constant 0 : index
    %c0_33 = arith.constant 0 : index
    %37 = vector.load %arg13[%c0_32, %c0_33] : memref<4x128xf32, #tpu.memory_space<vmem>>, vector<4x128xf32>
    %cst_34 = arith.constant dense<0.000000e+00> : vector<8x128xf32>
    %38 = tpu.matmul %3, %37, %cst_34 {dimension_numbers = #tpu.dot_dimension_numbers<[1], [0], [0], [1], [0, 0, 1, 1], [], []>} : vector<8x4xf32>, vector<4x128xf32>, vector<8x128xf32> -> vector<8x128xf32>
    %39 = arith.addf %36, %38 : vector<8x128xf32>
    %c0_35 = arith.constant 0 : index
    %c0_36 = arith.constant 0 : index
    %40 = vector.load %arg14[%c0_35, %c0_36] : memref<1x128xf32, #tpu.memory_space<vmem>>, vector<1x128xf32>
    %41 = vector.broadcast %40 : vector<1x128xf32> to vector<8x128xf32>
    %42 = arith.addf %39, %41 : vector<8x128xf32>
    %cst_37 = arith.constant 0.000000e+00 : f32
    %43 = vector.broadcast %cst_37 : f32 to vector<8x128xf32>
    %44 = arith.maximumf %42, %43 : vector<8x128xf32>
    %c0_38 = arith.constant 0 : index
    %c0_39 = arith.constant 0 : index
    %45 = vector.load %arg15[%c0_38, %c0_39] : memref<128x64xf32, #tpu.memory_space<vmem>>, vector<128x64xf32>
    %cst_40 = arith.constant dense<0.000000e+00> : vector<8x64xf32>
    %46 = tpu.matmul %44, %45, %cst_40 {dimension_numbers = #tpu.dot_dimension_numbers<[1], [0], [0], [1], [0, 0, 1, 1], [], []>} : vector<8x128xf32>, vector<128x64xf32>, vector<8x64xf32> -> vector<8x64xf32>
    %c0_41 = arith.constant 0 : index
    %c0_42 = arith.constant 0 : index
    %47 = vector.load %arg16[%c0_41, %c0_42] : memref<1x64xf32, #tpu.memory_space<vmem>>, vector<1x64xf32>
    %48 = vector.broadcast %47 : vector<1x64xf32> to vector<8x64xf32>
    %49 = arith.addf %46, %48 : vector<8x64xf32>
    %cst_43 = arith.constant 0.000000e+00 : f32
    %50 = vector.broadcast %cst_43 : f32 to vector<8x64xf32>
    %51 = arith.maximumf %49, %50 : vector<8x64xf32>
    %c0_44 = arith.constant 0 : index
    %c0_45 = arith.constant 0 : index
    %52 = vector.load %arg17[%c0_44, %c0_45] : memref<64x2xf32, #tpu.memory_space<vmem>>, vector<64x2xf32>
    %cst_46 = arith.constant dense<0.000000e+00> : vector<8x2xf32>
    %53 = tpu.matmul %51, %52, %cst_46 {dimension_numbers = #tpu.dot_dimension_numbers<[1], [0], [0], [1], [0, 0, 1, 1], [], []>} : vector<8x64xf32>, vector<64x2xf32>, vector<8x2xf32> -> vector<8x2xf32>
    %c0_47 = arith.constant 0 : index
    %c0_48 = arith.constant 0 : index
    %54 = vector.load %arg18[%c0_47, %c0_48] : memref<1x2xf32, #tpu.memory_space<vmem>>, vector<1x2xf32>
    %55 = vector.broadcast %54 : vector<1x2xf32> to vector<8x2xf32>
    %56 = arith.addf %53, %55 : vector<8x2xf32>
    %57 = math.tanh %56 : vector<8x2xf32>
    %cst_49 = arith.constant 1.000000e+00 : f32
    %58 = vector.broadcast %cst_49 : f32 to vector<8x2xf32>
    %59 = arith.mulf %57, %58 : vector<8x2xf32>
    %60 = arith.addf %59, %2 : vector<8x2xf32>
    %c0_50 = arith.constant 0 : index
    %c0_51 = arith.constant 0 : index
    %61 = vector.load %arg19[%c0_50, %c0_51] : memref<8x2xf32, #tpu.memory_space<vmem>>, vector<8x2xf32>
    tpu.vector_store %arg19[%c0_50, %c0_51], %60 {strides = array<i32>} : memref<8x2xf32, #tpu.memory_space<vmem>>, vector<8x2xf32>,
    return
  }
  func.func @transform_0(%arg0: i32) -> (i32, i32) {
    %c0_i32 = arith.constant 0 : i32
    %c0_i32_0 = arith.constant 0 : i32
    return %arg0, %c0_i32 : i32, i32
  }
  func.func @transform_1(%arg0: i32) -> (i32, i32, i32) {
    %c0_i32 = arith.constant 0 : i32
    %c0_i32_0 = arith.constant 0 : i32
    %c0_i32_1 = arith.constant 0 : i32
    return %arg0, %c0_i32, %c0_i32_0 : i32, i32, i32
  }
  func.func @transform_2(%arg0: i32) -> (i32, i32) {
    %c0_i32 = arith.constant 0 : i32
    %c0_i32_0 = arith.constant 0 : i32
    return %arg0, %c0_i32 : i32, i32
  }
  func.func @transform_3(%arg0: i32) -> (i32, i32) {
    %c0_i32 = arith.constant 0 : i32
    %c0_i32_0 = arith.constant 0 : i32
    return %arg0, %c0_i32 : i32, i32
  }
  func.func @transform_4(%arg0: i32) -> (i32, i32) {
    %c0_i32 = arith.constant 0 : i32
    %c0_i32_0 = arith.constant 0 : i32
    %c0_i32_1 = arith.constant 0 : i32
    return %c0_i32, %c0_i32_0 : i32, i32
  }
  func.func @transform_5(%arg0: i32) -> (i32, i32) {
    %c0_i32 = arith.constant 0 : i32
    %c0_i32_0 = arith.constant 0 : i32
    %c0_i32_1 = arith.constant 0 : i32
    return %c0_i32, %c0_i32_0 : i32, i32
  }
  func.func @transform_6(%arg0: i32) -> (i32, i32) {
    %c0_i32 = arith.constant 0 : i32
    %c0_i32_0 = arith.constant 0 : i32
    %c0_i32_1 = arith.constant 0 : i32
    return %c0_i32, %c0_i32_0 : i32, i32
  }
  func.func @transform_7(%arg0: i32) -> (i32, i32) {
    %c0_i32 = arith.constant 0 : i32
    %c0_i32_0 = arith.constant 0 : i32
    %c0_i32_1 = arith.constant 0 : i32
    return %c0_i32, %c0_i32_0 : i32, i32
  }
  func.func @transform_8(%arg0: i32) -> (i32, i32) {
    %c0_i32 = arith.constant 0 : i32
    %c0_i32_0 = arith.constant 0 : i32
    %c0_i32_1 = arith.constant 0 : i32
    return %c0_i32, %c0_i32_0 : i32, i32
  }
  func.func @transform_9(%arg0: i32) -> (i32, i32) {
    %c0_i32 = arith.constant 0 : i32
    %c0_i32_0 = arith.constant 0 : i32
    %c0_i32_1 = arith.constant 0 : i32
    return %c0_i32, %c0_i32_0 : i32, i32
  }
  func.func @transform_10(%arg0: i32) -> (i32, i32) {
    %c0_i32 = arith.constant 0 : i32
    %c0_i32_0 = arith.constant 0 : i32
    %c0_i32_1 = arith.constant 0 : i32
    return %c0_i32, %c0_i32_0 : i32, i32
  }
  func.func @transform_11(%arg0: i32) -> (i32, i32) {
    %c0_i32 = arith.constant 0 : i32
    %c0_i32_0 = arith.constant 0 : i32
    %c0_i32_1 = arith.constant 0 : i32
    return %c0_i32, %c0_i32_0 : i32, i32
  }
  func.func @transform_12(%arg0: i32) -> (i32, i32) {
    %c0_i32 = arith.constant 0 : i32
    %c0_i32_0 = arith.constant 0 : i32
    %c0_i32_1 = arith.constant 0 : i32
    return %c0_i32, %c0_i32_0 : i32, i32
  }
  func.func @transform_13(%arg0: i32) -> (i32, i32) {
    %c0_i32 = arith.constant 0 : i32
    %c0_i32_0 = arith.constant 0 : i32
    %c0_i32_1 = arith.constant 0 : i32
    return %c0_i32, %c0_i32_0 : i32, i32
  }
  func.func @transform_14(%arg0: i32) -> (i32, i32) {
    %c0_i32 = arith.constant 0 : i32
    %c0_i32_0 = arith.constant 0 : i32
    %c0_i32_1 = arith.constant 0 : i32
    return %c0_i32, %c0_i32_0 : i32, i32
  }
  func.func @transform_15(%arg0: i32) -> (i32, i32) {
    %c0_i32 = arith.constant 0 : i32
    %c0_i32_0 = arith.constant 0 : i32
    %c0_i32_1 = arith.constant 0 : i32
    return %c0_i32, %c0_i32_0 : i32, i32
  }
  func.func @transform_16(%arg0: i32) -> (i32, i32) {
    %c0_i32 = arith.constant 0 : i32
    %c0_i32_0 = arith.constant 0 : i32
    %c0_i32_1 = arith.constant 0 : i32
    return %c0_i32, %c0_i32_0 : i32, i32
  }
  func.func @transform_17(%arg0: i32) -> (i32, i32) {
    %c0_i32 = arith.constant 0 : i32
    %c0_i32_0 = arith.constant 0 : i32
    %c0_i32_1 = arith.constant 0 : i32
    return %c0_i32, %c0_i32_0 : i32, i32
  }
  func.func @transform_18(%arg0: i32) -> (i32, i32) {
    %c0_i32 = arith.constant 0 : i32
    %c0_i32_0 = arith.constant 0 : i32
    return %arg0, %c0_i32 : i32, i32
  }
}

</mosaic_0001>

<bundles_post_ra>
// kernel: tpu_custom_call.1
= control target key start
LH: loop header
LB: loop body
LE: loop exit
PB: predicated region body
PF: predicated region fallthrough
CT: control target
= control target key end

     0   :  { %s1037_s0 = inlined_call_operand.vmem [shape: f32[8,4], index: 0, kind: input, shape index: {}]   ;;  %s1038_s1 = inlined_call_operand.vmem [shape: f32[8,8,4], index: 1, kind: input, shape index: {}]   ;;  %s1039_s2 = inlined_call_operand.vmem [shape: f32[8,2], index: 2, kind: input, shape index: {}]   ;;  %s1040_s3 = inlined_call_operand.vmem [shape: f32[8,4], index: 3, kind: input, shape index: {}]   ;;  %s1041_s4 = inlined_call_operand.vmem [shape: f32[4,64], index: 4, kind: input, shape index: {}]   ;;  %s1042_s5 = inlined_call_operand.vmem [shape: f32[1,64], index: 5, kind: input, shape index: {}]   ;;  %s1043_s6 = inlined_call_operand.hbm [shape: f32[64,128], index: 6, kind: input, shape index: {}]   ;;  %s1044_s7 = inlined_call_operand.vmem [shape: f32[1,128], index: 7, kind: input, shape index: {}]   ;;  %s1045_s8 = inlined_call_operand.vmem [shape: f32[128,128], index: 8, kind: input, shape index: {}]   ;;  %s1046_s9 = inlined_call_operand.vmem [shape: f32[1,128], index: 9, kind: input, shape index: {}]   ;;  %s1047_s10 = inlined_call_operand.vmem [shape: f32[128,128], index: 10, kind: input, shape index: {}]   ;;  %s1048_s11 = inlined_call_operand.vmem [shape: f32[2,128], index: 11, kind: input, shape index: {}]   ;;  %s1049_s12 = inlined_call_operand.vmem [shape: f32[4,128], index: 12, kind: input, shape index: {}]   ;;  %s1050_s13 = inlined_call_operand.vmem [shape: f32[1,128], index: 13, kind: input, shape index: {}]   ;;  %s1051_s14 = inlined_call_operand.vmem [shape: f32[128,64], index: 14, kind: input, shape index: {}]   ;;  %s1052_s15 = inlined_call_operand.vmem [shape: f32[1,64], index: 15, kind: input, shape index: {}]   ;;  %s1053_s16 = inlined_call_operand.vmem [shape: f32[64,2], index: 16, kind: input, shape index: {}]   ;;  %s1054_s17 = inlined_call_operand.vmem [shape: f32[1,2], index: 17, kind: input, shape index: {}]   ;;  %s1055_s18 = inlined_call_operand.vmem [shape: f32[8,2], index: 18, kind: output, shape index: {}]  }
   0x1   :  { %1057 = sst [smem:[#allocation5_spill]] %s1037_s0 }
   0x2   :  { %1058 = sst [smem:[#allocation6_spill]] %s1038_s1 }
   0x3   :  { %1059 = sst [smem:[#allocation7_spill]] %s1039_s2 }
   0x4   :  { %23 = vsyncpa [#allocation3], 0  ;;  %s40_s29 = sshll.u32 %s1043_s6, 4  ;;  %s669_s30 = smov [#allocation2]   ;;  %s41_s29 = int_to_ptr.hbm [resolvable:$true] %s40_s29 }
   0x5   :  { %s42_s0 = sshll.u32 %s669_s30, 4  ;;  %s670_s19 = smov 128   ;;  %s43_s0 = int_to_ptr.vmem [resolvable:$true] %s42_s0 }
   0x6   :  { %s671_s1 = smov 8  }
   0x7   :  { %48 = dma.hbm_to_vmem [thread:$0]  %s41_s29, 1024, %s43_s0, [#allocation3], %s670_s19, %s670_s19, %s671_s1  }
   0x8   :  { %667 = dma.done.wait [#allocation3], 1024  }
   0x9   :  { %668 = vsyncadd [#allocation3], 4294966272  ;;  %vm148_vm0 = vcmask 1043456   ;;  %v118_v0 = vld [vmem:[%s1041_s4] sm:$0xf]  ;;  %s1060_s23 = sld [smem:[#allocation5_spill]] }
   0xa   :  { %s1061_s25 = sld [smem:[#allocation6_spill]]  ;;  %610 = vmatpush.msk.msra.mxu0 %vm148_vm0, %v118_v0  ;;  %vm123_vm1 = vcmask 31744   ;;  %v208_v19 = vld [vmem:[#allocation2 + $0x38] sm:$0xff]  ;;  %v207_v20 = vld [vmem:[#allocation2 + $0x30] sm:$0xff]  ;;  %v206_v22 = vld [vmem:[#allocation2 + $0x28] sm:$0xff]  ;;  %vm213_vm2 = vcmask 523264  }
   0xb   :  { %246 = vmatpush.msra.mxu1 %v208_v19  ;;  %v205_v25 = vld [vmem:[#allocation2 + $0x20] sm:$0xff]  ;;  %v204_v26 = vld [vmem:[#allocation2 + $0x18] sm:$0xff]  ;;  %v203_v38 = vld [vmem:[#allocation2 + $0x10] sm:$0xff]  ;;  %vm425_vm3 = vcmask 1041408   ;;  %vm421_vm4 = vcmask 15360   ;;  %vm457_vm5 = vcmask 1041409  }
   0xc   :  { %v202_v39 = vld [vmem:[#allocation2 + $0x8] sm:$0xff]  ;;  %v201_v40 = vld [vmem:[#allocation2] sm:$0xff]  ;;  %v302_v54 = vld [vmem:[%s1045_s8 + $0x78] sm:$0xff]  ;;  %vm459_vm6 = vcmask 1042434   ;;  %vm461_vm7 = vcmask 1043459   ;;  %vm463_vm8 = vcmask 1044484  }
   0xd   :  { %247 = vmatpush.msra.mxu1 %v207_v20  ;;  %v635_v41 = vld [vmem:[%s1042_s5] ss:$0 sm:$0xff]  ;;  %v301_v55 = vld [vmem:[%s1045_s8 + $0x70] sm:$0xff]  ;;  %307 = vmatpush.msra.mxu2 %v302_v54  ;;  %v300_v56 = vld [vmem:[%s1045_s8 + $0x68] sm:$0xff]  ;;  %vm465_vm9 = vcmask 1045509   ;;  %vm467_vm10 = vcmask 1046534  }
   0xe   :  { %v299_v59 = vld [vmem:[%s1045_s8 + $0x60] sm:$0xff]  ;;  %v298_v61 = vld [vmem:[%s1045_s8 + $0x58] sm:$0xff]  ;;  %v297_v62 = vld [vmem:[%s1045_s8 + $0x50] sm:$0xff]  ;;  %vm469_vm11 = vcmask 1047559  }
   0xf   :  { %v75_v1 = vld [vmem:[%s1060_s23] sm:$0xff]  ;;  %248 = vmatpush.msra.mxu1 %v206_v22  ;;  %308 = vmatpush.msra.mxu2 %v301_v55  ;;  %v296_v63 = vld [vmem:[%s1045_s8 + $0x48] sm:$0xff] }
  0x10   :  { %v76_v2 = vld [vmem:[%s1061_s25] sm:$0xff]  ;;  %v94_v3 = vperm.slane %v75_v1, 0  ;;  %v87_v4 = vrot.slane %v75_v1, 1  ;;  %v77_v7 = vld [vmem:[%s1061_s25 + $0x8] sm:$0xff]  ;;  %v88_v9 = vrot.slane %v75_v1, 2  ;;  %v78_v11 = vld [vmem:[%s1061_s25 + $0x10] sm:$0xff] }
  0x11   :  { %v89_v13 = vrot.slane %v75_v1, 3  ;;  %v79_v15 = vld [vmem:[%s1061_s25 + $0x18] sm:$0xff]  ;;  %v90_v17 = vrot.slane %v75_v1, 4  ;;  %v80_v21 = vld [vmem:[%s1061_s25 + $0x20] sm:$0xff]  ;;  %v91_v24 = vrot.slane %v75_v1, 5  ;;  %249 = vmatpush.msra.mxu1 %v205_v25  ;;  %v81_v28 = vld [vmem:[%s1061_s25 + $0x28] sm:$0xff]  ;;  %309 = vmatpush.msra.mxu2 %v300_v56 }
  0x12   :  { %v110_v5 = vsub.f32 %v94_v3, %v76_v2  ;;  %v95_v6 = vperm.slane %v87_v4, 0  ;;  %v96_v10 = vperm.slane %v88_v9, 0  ;;  %v92_v30 = vrot.slane %v75_v1, 6  ;;  %v82_v32 = vld [vmem:[%s1061_s25 + $0x30] sm:$0xff]  ;;  %v83_v36 = vld [vmem:[%s1061_s25 + $0x38] sm:$0xff]  ;;  %v295_v2 = vld [vmem:[%s1045_s8 + $0x40] sm:$0xff] }
  0x13   :  { %v97_v14 = vperm.slane %v89_v13, 0  ;;  %v98_v18 = vperm.slane %v90_v17, 0  ;;  %v99_v27 = vperm.slane %v91_v24, 0  ;;  %250 = vmatpush.msra.mxu1 %v204_v26  ;;  %v93_v34 = vrot.slane %v75_v1, 7  ;;  %310 = vmatpush.msra.mxu2 %v299_v59  ;;  %v294_v4 = vld [vmem:[%s1045_s8 + $0x38] sm:$0xff]  ;;  %v291_v9 = vld [vmem:[%s1045_s8 + $0x20] sm:$0xff] }
  0x14   :  { %611 = vmatmul.msk.f32.vlgmr.msra.gmra.mxu0 %vm123_vm1, %v110_v5  ;;  %v111_v8 = vsub.f32 %v95_v6, %v77_v7  ;;  %v112_v12 = vsub.f32 %v96_v10, %v78_v11  ;;  %v100_v31 = vperm.slane %v92_v30, 0  ;;  %v293_v5 = vld [vmem:[%s1045_s8 + $0x30] sm:$0xff]  ;;  %v292_v6 = vld [vmem:[%s1045_s8 + $0x28] sm:$0xff]  ;;  %v290_v11 = vld [vmem:[%s1045_s8 + $0x18] sm:$0xff] }
  0x15   :  { %v113_v16 = vsub.f32 %v97_v14, %v79_v15  ;;  %v114_v23 = vsub.f32 %v98_v18, %v80_v21  ;;  %v115_v29 = vsub.f32 %v99_v27, %v81_v28  ;;  %v101_v35 = vperm.slane %v93_v34, 0  ;;  %251 = vmatpush.msra.mxu1 %v203_v38  ;;  %311 = vmatpush.msra.mxu2 %v298_v61  ;;  %v289_v15 = vld [vmem:[%s1045_s8 + $0x10] sm:$0xff]  ;;  %v287_v17 = vld [vmem:[%s1045_s8] sm:$0xff]  ;;  %v411_v56 = vld [vmem:[%s1047_s10 + $0x38] sm:$0xff] }
  0x16   :  { %v116_v33 = vsub.f32 %v100_v31, %v82_v32  ;;  %v636_v18 = vld [vmem:[%s1044_s7] ss:$0 sm:$0xff] }
  0x17   :  { %v117_v37 = vsub.f32 %v101_v35, %v83_v36  ;;  %252 = vmatpush.msra.mxu1 %v202_v39  ;;  %312 = vmatpush.msra.mxu2 %v297_v62  ;;  %v412_v55 = vld [vmem:[%s1047_s10 + $0x40] sm:$0xff] }
  0x18   :  { %v913_v61 = vld [vmem:[%s1046_s9] ss:$0 sm:$0xff] }
  0x19   :  { %253 = vmatpush.msra.mxu1 %v201_v40  ;;  %313 = vmatpush.msra.mxu2 %v296_v63  ;;  %v407_v63 = vld [vmem:[%s1047_s10 + $0x18] sm:$0xff] }
  0x1b   :  { %314 = vmatpush.msra.mxu2 %v295_v2  ;;  %v406_v2 = vld [vmem:[%s1047_s10 + $0x10] sm:$0xff] }
  0x1c   :  { %612 = vmatmul.msk.f32.gmra.mxu0 %vm123_vm1, %v111_v8 }
  0x1d   :  { %315 = vmatpush.msra.mxu2 %v294_v4 }
  0x1f   :  { %316 = vmatpush.msra.mxu2 %v293_v5  ;;  %v405_v5 = vld [vmem:[%s1047_s10 + $0x8] sm:$0xff] }
  0x21   :  { %317 = vmatpush.msra.mxu2 %v292_v6 }
  0x23   :  { %318 = vmatpush.msra.mxu2 %v291_v9 }
  0x24   :  { %613 = vmatmul.msk.f32.gmra.mxu0 %vm123_vm1, %v112_v12 }
  0x25   :  { %319 = vmatpush.msra.mxu2 %v290_v11 }
  0x27   :  { %320 = vmatpush.msra.mxu2 %v289_v15  ;;  %v492_v15 = vld [vmem:[%s1049_s12] sm:$0xf] }
  0x2c   :  { %614 = vmatmul.msk.f32.gmra.mxu0 %vm123_vm1, %v113_v16  ;;  %v288_v16 = vld [vmem:[%s1045_s8 + $0x8] sm:$0xff] }
  0x2d   :  { %321 = vmatpush.msra.mxu2 %v288_v16 }
  0x2f   :  { %322 = vmatpush.msra.mxu2 %v287_v17 }
  0x34   :  { %615 = vmatmul.msk.f32.gmra.mxu0 %vm123_vm1, %v114_v23 }
  0x3c   :  { %616 = vmatmul.msk.f32.gmra.mxu0 %vm123_vm1, %v115_v29 }
  0x44   :  { %617 = vmatmul.msk.f32.gmra.mxu0 %vm123_vm1, %v116_v33 }
  0x4c   :  { %618 = vmatmul.msk.f32.gmra.mxu0 %vm123_vm1, %v117_v37 }
  0x91   :  { %v169_v42 = vpop.f32.mrf.mxu0 }
  0x92   :  { %v170_v43 = vadd.f32 %v635_v41, %v169_v42 }
  0x94   :  { %v193_v44 = vmax.f32 %v170_v43, 0.0 }
  0x96   :  { %619 = vmatmul.msk.f32.vlgmr.msra.gmra.mxu1 %vm213_vm2, %v193_v44 }
  0x99   :  { %v172_v45 = vpop.f32.mrf.mxu0 }
  0x9a   :  { %v173_v46 = vadd.f32 %v635_v41, %v172_v45  ;;  %v420_v45 = vld [vmem:[%s1048_s11] sm:$0x3]  ;;  %s1062_s11 = sld [smem:[#allocation7_spill]] }
  0x9b   :  { %627 = vmatpush.msk.msra.mxu3 %vm425_vm3, %v420_v45 }
  0x9c   :  { %v194_v47 = vmax.f32 %v173_v46, 0.0  ;;  %v419_v46 = vld [vmem:[%s1047_s10 + $0x78] sm:$0xff] }
  0x9d   :  { %472 = vmatpush.msrb.mxu3 %v419_v46 }
  0x9e   :  { %620 = vmatmul.msk.f32.gmra.mxu1 %vm213_vm2, %v194_v47  ;;  %v418_v47 = vld [vmem:[%s1047_s10 + $0x70] sm:$0xff] }
  0x9f   :  { %473 = vmatpush.msrb.mxu3 %v418_v47  ;;  %v537_v47 = vld [vmem:[%s1051_s14 + $0x58] sm:$0xff] }
  0xa0   :  { %v918_v62 = vld [vmem:[%s1062_s11] sm:$0xff] }
  0xa1   :  { %v175_v48 = vpop.f32.mrf.mxu0  ;;  %628 = vmatmul.msk.f32.vlgmr.msra.gmra.mxu3 %vm421_vm4, %v918_v62 }
  0xa2   :  { %v176_v49 = vadd.f32 %v635_v41, %v175_v48  ;;  %v417_v48 = vld [vmem:[%s1047_s10 + $0x68] sm:$0xff] }
  0xa3   :  { %474 = vmatpush.msrb.mxu3 %v417_v48 }
  0xa4   :  { %v195_v50 = vmax.f32 %v176_v49, 0.0 }
  0xa6   :  { %621 = vmatmul.msk.f32.gmra.mxu1 %vm213_vm2, %v195_v50  ;;  %v416_v50 = vld [vmem:[%s1047_s10 + $0x60] sm:$0xff] }
  0xa7   :  { %475 = vmatpush.msrb.mxu3 %v416_v50 }
  0xa9   :  { %v178_v51 = vpop.f32.mrf.mxu0 }
  0xaa   :  { %v179_v52 = vadd.f32 %v635_v41, %v178_v51  ;;  %v415_v51 = vld [vmem:[%s1047_s10 + $0x58] sm:$0xff] }
  0xab   :  { %476 = vmatpush.msrb.mxu3 %v415_v51 }
  0xac   :  { %v196_v53 = vmax.f32 %v179_v52, 0.0  ;;  %v414_v52 = vld [vmem:[%s1047_s10 + $0x50] sm:$0xff] }
  0xad   :  { %477 = vmatpush.msrb.mxu3 %v414_v52 }
  0xae   :  { %622 = vmatmul.msk.f32.gmra.mxu1 %vm213_vm2, %v196_v53  ;;  %v413_v53 = vld [vmem:[%s1047_s10 + $0x48] sm:$0xff] }
  0xaf   :  { %478 = vmatpush.msrb.mxu3 %v413_v53  ;;  %v536_v53 = vld [vmem:[%s1051_s14 + $0x50] sm:$0xff] }
  0xb1   :  { %v181_v57 = vpop.f32.mrf.mxu0  ;;  %479 = vmatpush.msrb.mxu3 %v412_v55 }
  0xb2   :  { %v182_v58 = vadd.f32 %v635_v41, %v181_v57  ;;  %v410_v57 = vld [vmem:[%s1047_s10 + $0x30] sm:$0xff] }
  0xb3   :  { %480 = vmatpush.msrb.mxu3 %v411_v56 }
  0xb4   :  { %v197_v60 = vmax.f32 %v182_v58, 0.0  ;;  %v409_v58 = vld [vmem:[%s1047_s10 + $0x28] sm:$0xff] }
  0xb5   :  { %481 = vmatpush.msrb.mxu3 %v410_v57 }
  0xb6   :  { %623 = vmatmul.msk.f32.gmra.mxu1 %vm213_vm2, %v197_v60  ;;  %v408_v60 = vld [vmem:[%s1047_s10 + $0x20] sm:$0xff] }
  0xb7   :  { %482 = vmatpush.msrb.mxu3 %v409_v58 }
  0xb9   :  { %v184_v0 = vpop.f32.mrf.mxu0  ;;  %483 = vmatpush.msrb.mxu3 %v408_v60 }
  0xba   :  { %v185_v1 = vadd.f32 %v635_v41, %v184_v0 }
  0xbb   :  { %484 = vmatpush.msrb.mxu3 %v407_v63 }
  0xbc   :  { %v198_v3 = vmax.f32 %v185_v1, 0.0 }
  0xbd   :  { %485 = vmatpush.msrb.mxu3 %v406_v2 }
  0xbe   :  { %624 = vmatmul.msk.f32.gmra.mxu1 %vm213_vm2, %v198_v3 }
  0xbf   :  { %486 = vmatpush.msrb.mxu3 %v405_v5 }
  0xc1   :  { %v187_v7 = vpop.f32.mrf.mxu0 }
  0xc2   :  { %v188_v8 = vadd.f32 %v635_v41, %v187_v7  ;;  %v404_v7 = vld [vmem:[%s1047_s10] sm:$0xff] }
  0xc3   :  { %487 = vmatpush.msrb.mxu3 %v404_v7  ;;  %v533_v7 = vld [vmem:[%s1051_s14 + $0x38] sm:$0xff] }
  0xc4   :  { %v199_v10 = vmax.f32 %v188_v8, 0.0 }
  0xc5   :  { %629 = vmatpush.msk.msra.mxu3 %vm148_vm0, %v492_v15 }
  0xc6   :  { %625 = vmatmul.msk.f32.gmra.mxu1 %vm213_vm2, %v199_v10 }
  0xc9   :  { %v190_v12 = vpop.f32.mrf.mxu0 }
  0xca   :  { %v191_v13 = vadd.f32 %v635_v41, %v190_v12 }
  0xcc   :  { %v200_v14 = vmax.f32 %v191_v13, 0.0 }
  0xce   :  { %626 = vmatmul.msk.f32.gmra.mxu1 %vm213_vm2, %v200_v14 }
 0x113   :  { %v255_v19 = vpop.f32.mrf.mxu1 }
 0x114   :  { %v256_v20 = vadd.f32 %v636_v18, %v255_v19 }
 0x116   :  { %v279_v21 = vmax.f32 %v256_v20, 0.0 }
 0x118   :  { %323 = vmatmul.f32.vlgmr.msra.gmra.mxu2 %v279_v21 }
 0x11b   :  { %v258_v22 = vpop.f32.mrf.mxu1 }
 0x11c   :  { %v259_v23 = vadd.f32 %v636_v18, %v258_v22 }
 0x11e   :  { %v280_v24 = vmax.f32 %v259_v23, 0.0 }
 0x120   :  { %326 = vmatmul.f32.gmra.mxu2 %v280_v24 }
 0x123   :  { %v261_v25 = vpop.f32.mrf.mxu1 }
 0x124   :  { %v262_v26 = vadd.f32 %v636_v18, %v261_v25 }
 0x126   :  { %v281_v27 = vmax.f32 %v262_v26, 0.0 }
 0x128   :  { %329 = vmatmul.f32.gmra.mxu2 %v281_v27 }
 0x12b   :  { %v264_v28 = vpop.f32.mrf.mxu1 }
 0x12c   :  { %v265_v29 = vadd.f32 %v636_v18, %v264_v28 }
 0x12e   :  { %v282_v30 = vmax.f32 %v265_v29, 0.0 }
 0x130   :  { %332 = vmatmul.f32.gmra.mxu2 %v282_v30  ;;  %v541_v30 = vld [vmem:[%s1051_s14 + $0x78] sm:$0xff] }
 0x131   :  { %546 = vmatpush.msrb.mxu0 %v541_v30  ;;  %v527_v30 = vld [vmem:[%s1051_s14 + $0x8] sm:$0xff] }
 0x133   :  { %v267_v31 = vpop.f32.mrf.mxu1 }
 0x134   :  { %v268_v32 = vadd.f32 %v636_v18, %v267_v31  ;;  %v540_v31 = vld [vmem:[%s1051_s14 + $0x70] sm:$0xff] }
 0x135   :  { %547 = vmatpush.msrb.mxu0 %v540_v31  ;;  %v526_v31 = vld [vmem:[%s1051_s14] sm:$0xff] }
 0x136   :  { %v283_v33 = vmax.f32 %v268_v32, 0.0 }
 0x138   :  { %335 = vmatmul.f32.gmra.mxu2 %v283_v33 }
 0x13b   :  { %v270_v34 = vpop.f32.mrf.mxu1 }
 0x13c   :  { %v271_v35 = vadd.f32 %v636_v18, %v270_v34 }
 0x13e   :  { %v284_v36 = vmax.f32 %v271_v35, 0.0 }
 0x140   :  { %338 = vmatmul.f32.gmra.mxu2 %v284_v36  ;;  %v539_v36 = vld [vmem:[%s1051_s14 + $0x68] sm:$0xff] }
 0x141   :  { %548 = vmatpush.msrb.mxu0 %v539_v36  ;;  %v570_v36 = vld [vmem:[%s1053_s16 + $0x18] sm:$0xff] }
 0x143   :  { %v273_v37 = vpop.f32.mrf.mxu1 }
 0x144   :  { %v274_v38 = vadd.f32 %v636_v18, %v273_v37 }
 0x146   :  { %v285_v39 = vmax.f32 %v274_v38, 0.0 }
 0x148   :  { %341 = vmatmul.f32.gmra.mxu2 %v285_v39 }
 0x14b   :  { %v276_v40 = vpop.f32.mrf.mxu1 }
 0x14c   :  { %v277_v41 = vadd.f32 %v636_v18, %v276_v40 }
 0x14e   :  { %v286_v42 = vmax.f32 %v277_v41, 0.0  ;;  %v538_v41 = vld [vmem:[%s1051_s14 + $0x60] sm:$0xff] }
 0x14f   :  { %549 = vmatpush.msrb.mxu0 %v538_v41 }
 0x150   :  { %344 = vmatmul.f32.gmra.mxu2 %v286_v42 }
 0x151   :  { %550 = vmatpush.msrb.mxu0 %v537_v47  ;;  %v567_v47 = vld [vmem:[%s1053_s16] sm:$0xff] }
 0x153   :  { %551 = vmatpush.msrb.mxu0 %v536_v53 }
 0x19b   :  { %v324_v43 = vpop.f32.mrf.mxu2 }
 0x19c   :  { %v325_v3 = vadd.f32 %v913_v61, %v324_v43 }
 0x19e   :  { %v348_v11 = vmax.f32 %v325_v3, 0.0 }
 0x1a0   :  { %v356_v19 = vrot.slane %v348_v11, 4 }
 0x1a2   :  { %v357_v26 = vmax.f32 %v348_v11, %v356_v19 }
 0x1a3   :  { %v327_v44 = vpop.f32.mrf.mxu2 }
 0x1a4   :  { %v328_v0 = vadd.f32 %v913_v61, %v327_v44  ;;  %v358_v37 = vrot.slane %v357_v26, 2 }
 0x1a6   :  { %v349_v8 = vmax.f32 %v328_v0, 0.0  ;;  %v359_v48 = vmax.f32 %v357_v26, %v358_v37  ;;  %v85_v26 = vld [vmem:[%s1040_s3] sm:$0xff]  ;;  %v446_v37 = vpop.f32.mrf.mxu3 }
 0x1a8   :  { %v362_v16 = vrot.slane %v349_v8, 4  ;;  %v360_v60 = vrot.slane %v359_v48, 1 }
 0x1aa   :  { %v363_v22 = vmax.f32 %v349_v8, %v362_v16  ;;  %v361_v8 = vmax.f32 %v359_v48, %v360_v60  ;;  %v639_v48 = vld [vmem:[%s1052_s15] ss:$0 sm:$0xff] }
 0x1ab   :  { %v330_v49 = vpop.f32.mrf.mxu2 }
 0x1ac   :  { %v331_v1 = vadd.f32 %v913_v61, %v330_v49  ;;  %v364_v32 = vrot.slane %v363_v22, 2 }
 0x1ae   :  { %v350_v9 = vmax.f32 %v331_v1, 0.0  ;;  %v365_v42 = vmax.f32 %v363_v22, %v364_v32  ;;  %v534_v1 = vld [vmem:[%s1051_s14 + $0x40] sm:$0xff]  ;;  %v574_v32 = vld [vmem:[%s1053_s16 + $0x38] sm:$0xff] }
 0x1b0   :  { %v368_v18 = vrot.slane %v350_v9, 4 }
 0x1b2   :  { %v369_v24 = vmax.f32 %v350_v9, %v368_v18  ;;  %v531_v18 = vld [vmem:[%s1051_s14 + $0x28] sm:$0xff] }
 0x1b3   :  { %v333_v54 = vpop.f32.mrf.mxu2 }
 0x1b4   :  { %v334_v4 = vadd.f32 %v913_v61, %v333_v54  ;;  %v370_v35 = vrot.slane %v369_v24, 2  ;;  %v366_v54 = vrot.slane %v365_v42, 1 }
 0x1b6   :  { %v351_v12 = vmax.f32 %v334_v4, 0.0  ;;  %v371_v45 = vmax.f32 %v369_v24, %v370_v35  ;;  %v367_v2 = vmax.f32 %v365_v42, %v366_v54  ;;  %v571_v35 = vld [vmem:[%s1053_s16 + $0x20] sm:$0xff] }
 0x1b8   :  { %v374_v20 = vrot.slane %v351_v12, 4  ;;  %v372_v57 = vrot.slane %v371_v45, 1 }
 0x1ba   :  { %v375_v27 = vmax.f32 %v351_v12, %v374_v20  ;;  %v373_v5 = vmax.f32 %v371_v45, %v372_v57  ;;  %v532_v12 = vld [vmem:[%s1051_s14 + $0x30] sm:$0xff] }
 0x1bb   :  { %v336_v59 = vpop.f32.mrf.mxu2  ;;  %v569_v45 = vld [vmem:[%s1053_s16 + $0x10] sm:$0xff] }
 0x1bc   :  { %v337_v6 = vadd.f32 %v913_v61, %v336_v59  ;;  %v376_v38 = vrot.slane %v375_v27, 2  ;;  %v535_v59 = vld [vmem:[%s1051_s14 + $0x48] sm:$0xff] }
 0x1bd   :  { %552 = vmatpush.msrb.mxu0 %v535_v59 }
 0x1be   :  { %v352_v14 = vmax.f32 %v337_v6, 0.0  ;;  %v377_v49 = vmax.f32 %v375_v27, %v376_v38  ;;  %v530_v27 = vld [vmem:[%s1051_s14 + $0x20] sm:$0xff] }
 0x1bf   :  { %553 = vmatpush.msrb.mxu0 %v534_v1 }
 0x1c0   :  { %v380_v21 = vrot.slane %v352_v14, 4  ;;  %v378_v63 = vrot.slane %v377_v49, 1 }
 0x1c1   :  { %554 = vmatpush.msrb.mxu0 %v533_v7 }
 0x1c2   :  { %v381_v29 = vmax.f32 %v352_v14, %v380_v21  ;;  %v379_v9 = vmax.f32 %v377_v49, %v378_v63 }
 0x1c3   :  { %v339_v10 = vpop.f32.mrf.mxu2  ;;  %555 = vmatpush.msrb.mxu0 %v532_v12 }
 0x1c4   :  { %v340_v13 = vadd.f32 %v913_v61, %v339_v10  ;;  %v382_v40 = vrot.slane %v381_v29, 2 }
 0x1c5   :  { %556 = vmatpush.msrb.mxu0 %v531_v18 }
 0x1c6   :  { %v353_v17 = vmax.f32 %v340_v13, 0.0  ;;  %v383_v52 = vmax.f32 %v381_v29, %v382_v40  ;;  %v458_v13 = vsel %vm457_vm5, %v367_v2, %v361_v8  ;;  %v528_v29 = vld [vmem:[%s1051_s14 + $0x10] sm:$0xff]  ;;  %v638_v40 = vld [vmem:[%s1050_s13] ss:$0 sm:$0xff] }
 0x1c7   :  { %v460_v16 = vsel %vm459_vm6, %v373_v5, %v458_v13  ;;  %557 = vmatpush.msrb.mxu0 %v530_v27 }
 0x1c8   :  { %v386_v23 = vrot.slane %v353_v17, 4  ;;  %v462_v20 = vsel %vm461_vm7, %v379_v9, %v460_v16 }
 0x1ca   :  { %v387_v33 = vmax.f32 %v353_v17, %v386_v23 }
 0x1cb   :  { %v342_v25 = vpop.f32.mrf.mxu2 }
 0x1cc   :  { %v343_v28 = vadd.f32 %v913_v61, %v342_v25  ;;  %v388_v43 = vrot.slane %v387_v33, 2 }
 0x1ce   :  { %v354_v34 = vmax.f32 %v343_v28, 0.0  ;;  %v389_v55 = vmax.f32 %v387_v33, %v388_v43  ;;  %v529_v28 = vld [vmem:[%s1051_s14 + $0x18] sm:$0xff]  ;;  %v573_v33 = vld [vmem:[%s1053_s16 + $0x30] sm:$0xff] }
 0x1cf   :  { %558 = vmatpush.msrb.mxu0 %v529_v28 }
 0x1d0   :  { %v392_v39 = vrot.slane %v354_v34, 4  ;;  %v390_v3 = vrot.slane %v389_v55, 1 }
 0x1d1   :  { %559 = vmatpush.msrb.mxu0 %v528_v29 }
 0x1d2   :  { %v393_v44 = vmax.f32 %v354_v34, %v392_v39  ;;  %v391_v14 = vmax.f32 %v389_v55, %v390_v3  ;;  %v572_v34 = vld [vmem:[%s1053_s16 + $0x28] sm:$0xff] }
 0x1d3   :  { %v345_v46 = vpop.f32.mrf.mxu2  ;;  %560 = vmatpush.msrb.mxu0 %v527_v30 }
 0x1d4   :  { %v394_v50 = vrot.slane %v393_v44, 2  ;;  %v346_v51 = vadd.f32 %v913_v61, %v345_v46  ;;  %v384_v61 = vrot.slane %v383_v52, 1  ;;  %v568_v46 = vld [vmem:[%s1053_s16 + $0x8] sm:$0xff] }
 0x1d5   :  { %561 = vmatpush.msrb.mxu0 %v526_v31 }
 0x1d6   :  { %v355_v56 = vmax.f32 %v346_v51, 0.0  ;;  %v395_v58 = vmax.f32 %v393_v44, %v394_v50  ;;  %v385_v11 = vmax.f32 %v383_v52, %v384_v61  ;;  %v640_v52 = vld [vmem:[%s1054_s17] ss:$0 sm:$0xff] }
 0x1d8   :  { %v398_v0 = vrot.slane %v355_v56, 4  ;;  %v396_v6 = vrot.slane %v395_v58, 1  ;;  %v464_v21 = vsel %vm463_vm8, %v385_v11, %v462_v20 }
 0x1d9   :  { %v466_v23 = vsel %vm465_vm9, %v391_v14, %v464_v21 }
 0x1da   :  { %v399_v4 = vmax.f32 %v355_v56, %v398_v0  ;;  %v397_v17 = vmax.f32 %v395_v58, %v396_v6 }
 0x1dc   :  { %v400_v10 = vrot.slane %v399_v4, 2  ;;  %v468_v24 = vsel %vm467_vm10, %v397_v17, %v466_v23 }
 0x1de   :  { %v401_v15 = vmax.f32 %v399_v4, %v400_v10 }
 0x1e0   :  { %v402_v19 = vrot.slane %v401_v15, 1 }
 0x1e2   :  { %v403_v22 = vmax.f32 %v401_v15, %v402_v19 }
 0x1e4   :  { %v470_v25 = vsel %vm469_vm11, %v403_v22, %v468_v24 }
 0x1e5   :  { %488 = vmatmul.f32.vlgmr.msrb.gmra.mxu3 %v470_v25 }
 0x1e6   :  { %590 = vmatpush.msrb.mxu3 %v574_v32 }
 0x1e8   :  { %591 = vmatpush.msrb.mxu3 %v573_v33 }
 0x1ea   :  { %592 = vmatpush.msrb.mxu3 %v572_v34 }
 0x1ec   :  { %593 = vmatpush.msrb.mxu3 %v571_v35 }
 0x1ed   :  { %630 = vmatmul.msk.f32.vlgmr.msra.gmra.mxu3 %vm123_vm1, %v85_v26 }
 0x1ee   :  { %594 = vmatpush.msrb.mxu3 %v570_v36 }
 0x1f0   :  { %595 = vmatpush.msrb.mxu3 %v569_v45 }
 0x1f2   :  { %596 = vmatpush.msrb.mxu3 %v568_v46 }
 0x1f4   :  { %597 = vmatpush.msrb.mxu3 %v567_v47 }
 0x268   :  { %v489_v38 = vpop.f32.mrf.mxu3 }
 0x269   :  { %v490_v39 = vadd.f32 %v489_v38, %v446_v37 }
 0x270   :  { %v516_v41 = vpop.f32.mrf.mxu3 }
 0x271   :  { %v519_v42 = vadd.f32 %v516_v41, %v490_v39 }
 0x273   :  { %v524_v43 = vadd.f32 %v638_v40, %v519_v42 }
 0x275   :  { %v525_v44 = vmax.f32 %v524_v43, 0.0 }
 0x277   :  { %562 = vmatmul.f32.vlgmr.msrb.gmra.mxu0 %v525_v44 }
 0x2f4   :  { %v563_v49 = vpop.f32.mrf.mxu0 }
 0x2f5   :  { %v564_v50 = vadd.f32 %v639_v48, %v563_v49 }
 0x2f7   :  { %v566_v51 = vmax.f32 %v564_v50, 0.0 }
 0x2f9   :  { %631 = vmatmul.msk.f32.vlgmr.msrb.gmra.mxu3 %vm213_vm2, %v566_v51 }
 0x37c   :  { %v599_v53 = vpop.f32.mrf.mxu3 }
 0x37d   :  { %v600_v54 = vadd.f32 %v640_v52, %v599_v53 }
 0x37f   :  { %641 = vtanh.f32 %v600_v54 }
 0x385   :  { %v642_v55 = vpop.eup %641 }
 0x386   :  { %v603_v56 = vadd.f32 %v642_v55, %v918_v62 }
 0x388   :  { %604 = vst.msk [vmem:[%s1055_s18] sm:$0xff] %vm421_vm4, %v603_v56 }
 0x389   :  { %609 = vsyncpa [#allocation3], 1 }

</bundles_post_ra>
